<compile_context>
chip_gen: v6e
topology: v6e:2x2x1
jax: 0.10.0
libtpu: 0.0.40
codegen_flags: <defaults>
</compile_context>

<pallas_src>
import functools

import jax
import jax.numpy as jnp
from jax import lax
from jax.experimental import pallas as pl
from jax.experimental.pallas import tpu as pltpu


# ----------------------------------------------------------------------------
# Pallas kernel: blocked row-sum -> mean -> sigmoid (accumulate into o_ref)
# ----------------------------------------------------------------------------
def _summarizer_kernel(z_ref, o_ref, *, n_rows, block_rows, mask_rows, inv_n):
    i = pl.program_id(1)  # row-block (reduction) axis, innermost

    @pl.when(i == 0)
    def _init():
        o_ref[...] = jnp.zeros_like(o_ref)

    blk = z_ref[...].astype(jnp.float32)  # in-kernel upcast (bf16/fp8 stay narrow in HBM)
    if mask_rows:
        # Ragged last block: rows >= true N hold garbage -> zero them out.
        row = lax.broadcasted_iota(jnp.int32, blk.shape, 0) + i * block_rows
        blk = jnp.where(row < n_rows, blk, 0.0)

    # Partial row-sum accumulated directly into the resident f32 output block.
    o_ref[...] += jnp.sum(blk, axis=0, keepdims=True)

    @pl.when(i == pl.num_programs(1) - 1)
    def _finalize():
        o_ref[...] = jax.nn.sigmoid(o_ref[...] * inv_n)


def summarizer_pallas(z, *, block_bytes_budget=8 * 1024 * 1024):
    """z: [N, D] -> sigmoid(mean over rows): [D] (same dtype as z)."""
    n, d = z.shape
    itemsize = jnp.dtype(z.dtype).itemsize

    # ---- lane (feature) tiling --------------------------------------------
    # Split D across two 128-aligned column blocks when possible so both v7x
    # TensorCores participate; otherwise a single block equal to the full D
    # (no 128-divisibility needed, no padding, output store stays unmasked
    # whenever D itself is lane-aligned).
    if d % 256 == 0:
        td, ncol = d // 2, 2
    else:
        td, ncol = d, 1

    # ---- row (reduction) tiling by bytes budget ---------------------------
    # Sublane packing: rows per vreg sublane group = 8 (f32) / 16 (bf16) / 32 (8-bit).
    sub = 8 * max(1, 4 // itemsize)
    budget_rows = max(sub, (block_bytes_budget // max(1, td * itemsize)) // sub * sub)
    if n <= budget_rows:
        bn = n          # single row block == full array dim: always legal, no masking
    else:
        bn = budget_rows
    nrow = pl.cdiv(n, bn)
    mask_rows = (n % bn) != 0

    kernel = functools.partial(
        _summarizer_kernel,
        n_rows=n, block_rows=bn, mask_rows=mask_rows, inv_n=1.0 / n,
    )

    out = pl.pallas_call(
        kernel,
        out_shape=jax.ShapeDtypeStruct((1, d), jnp.float32),
        grid=(ncol, nrow),
        in_specs=[pl.BlockSpec((bn, td), lambda j, i: (i, j))],
        out_specs=pl.BlockSpec((1, td), lambda j, i: (0, j)),  # resident across i
        compiler_params=pltpu.CompilerParams(
            dimension_semantics=("parallel", "arbitrary"),
            vmem_limit_bytes=32 * 1024 * 1024,
        ),
    )(z)
    # Tiny [D] cast back to the input dtype (matches PyTorch's output dtype).
    return out[0].astype(z.dtype)


# ----------------------------------------------------------------------------
# Pure-JAX reference (matches torch.sigmoid(z.mean(dim=0)))
# ----------------------------------------------------------------------------
def summarizer_ref(z):
    return jax.nn.sigmoid(jnp.mean(z.astype(jnp.float32), axis=0)).astype(z.dtype)


if __name__ == "__main__":
    key = jax.random.PRNGKey(0)
    k1, k2, k3 = jax.random.split(key, 3)

    # 1) Typical DGI-style summarizer input: node embeddings [N, D], f32.
    #    D % 256 == 0 -> exercises the 2-column (megacore) path, single row block.
    N, D = 64, 256
    z = jax.random.normal(k1, (N, D), jnp.float32)
    out = jax.block_until_ready(summarizer_pallas(z))
    ref = summarizer_ref(z)
    assert out.shape == (D,) and out.dtype == z.dtype
    assert jnp.allclose(out, ref, rtol=1e-5, atol=1e-6), "mismatch (f32 case)"

    # 2) Ragged feature dim + bf16 input: full-D block, in-kernel upcast.
    N2, D2 = 50, 200
    z2 = jax.random.normal(k2, (N2, D2), jnp.float32).astype(jnp.bfloat16)
    out2 = jax.block_until_ready(summarizer_pallas(z2))
    ref2 = summarizer_ref(z2)
    assert out2.shape == (D2,) and out2.dtype == jnp.bfloat16
    assert jnp.allclose(out2.astype(jnp.float32), ref2.astype(jnp.float32),
                        rtol=1e-2, atol=1e-2), "mismatch (bf16 ragged case)"

    # 3) Multi row-block streaming path with a ragged last block (small budget
    #    forces several row blocks + the in-kernel row mask).
    N3, D3 = 1000, 256
    z3 = jax.random.normal(k3, (N3, D3), jnp.float32)
    out3 = jax.block_until_ready(summarizer_pallas(z3, block_bytes_budget=128 * 1024))
    ref3 = summarizer_ref(z3)
    assert out3.shape == (D3,)
    assert jnp.allclose(out3, ref3, rtol=1e-5, atol=1e-6), "mismatch (streaming case)"

    print("KERNEL_OK")
</pallas_src>

<mosaic_0001>
module attributes {stable_mosaic.version = 11 : i64} {
  func.func @_summarizer_kernel(%arg0: i32, %arg1: i32, %arg2: memref<64x128xf32, #tpu.memory_space<vmem>>, %arg3: memref<1x128xf32, #tpu.memory_space<vmem>>) attributes {dimension_semantics = [#tpu.dimension_semantics<parallel>, #tpu.dimension_semantics<arbitrary>], iteration_bounds = array<i64: 2, 1>, scalar_prefetch = 0 : i64, scratch_operands = 0 : i64, tpu.core_type = #tpu.core_type<tc>, window_params = [{transform_indices = @transform_0, window_bounds = array<i64: 64, 128>}, {transform_indices = @transform_1, window_bounds = array<i64: 1, 128>}]} {
    %c0_i32 = arith.constant 0 : i32
    %0 = arith.cmpi eq, %arg1, %c0_i32 : i32
    %1 = arith.extui %0 : i1 to i32
    %c0_i32_0 = arith.constant 0 : i32
    %2 = arith.cmpi ne, %1, %c0_i32_0 : i32
    scf.if %2 {
      %cst_8 = arith.constant 0.000000e+00 : f32
      %12 = vector.broadcast %cst_8 : f32 to vector<1x128xf32>
      %c0_9 = arith.constant 0 : index
      %c0_10 = arith.constant 0 : index
      %13 = vector.load %arg3[%c0_9, %c0_10] : memref<1x128xf32, #tpu.memory_space<vmem>>, vector<1x128xf32>
      tpu.vector_store %arg3[%c0_9, %c0_10], %12 {strides = array<i32>} : memref<1x128xf32, #tpu.memory_space<vmem>>, vector<1x128xf32>,
    } else {
    }
    %c0 = arith.constant 0 : index
    %c0_1 = arith.constant 0 : index
    %3 = vector.load %arg2[%c0, %c0_1] : memref<64x128xf32, #tpu.memory_space<vmem>>, vector<64x128xf32>
    %c0_2 = arith.constant 0 : index
    %c0_3 = arith.constant 0 : index
    %4 = vector.load %arg3[%c0_2, %c0_3] : memref<1x128xf32, #tpu.memory_space<vmem>>, vector<1x128xf32>
    %cst = arith.constant dense<0.000000e+00> : vector<128xf32>
    %5 = vector.multi_reduction <add>, %3, %cst [0] : vector<64x128xf32> to vector<128xf32>
    %6 = vector.shape_cast %5 : vector<128xf32> to vector<1x128xf32>
    %7 = arith.addf %4, %6 : vector<1x128xf32>
    %c0_4 = arith.constant 0 : index
    %c0_5 = arith.constant 0 : index
    %8 = vector.load %arg3[%c0_4, %c0_5] : memref<1x128xf32, #tpu.memory_space<vmem>>, vector<1x128xf32>
    tpu.vector_store %arg3[%c0_4, %c0_5], %7 {strides = array<i32>} : memref<1x128xf32, #tpu.memory_space<vmem>>, vector<1x128xf32>,
    %c0_i32_6 = arith.constant 0 : i32
    %9 = arith.cmpi eq, %arg1, %c0_i32_6 : i32
    %10 = arith.extui %9 : i1 to i32
    %c0_i32_7 = arith.constant 0 : i32
    %11 = arith.cmpi ne, %10, %c0_i32_7 : i32
    scf.if %11 {
      %c0_8 = arith.constant 0 : index
      %c0_9 = arith.constant 0 : index
      %12 = vector.load %arg3[%c0_8, %c0_9] : memref<1x128xf32, #tpu.memory_space<vmem>>, vector<1x128xf32>
      %cst_10 = arith.constant 1.562500e-02 : f32
      %13 = vector.broadcast %cst_10 : f32 to vector<1x128xf32>
      %14 = arith.mulf %12, %13 : vector<1x128xf32>
      %15 = arith.negf %14 : vector<1x128xf32>
      %16 = math.exp %15 : vector<1x128xf32>
      %cst_11 = arith.constant 1.000000e+00 : f32
      %17 = vector.broadcast %cst_11 : f32 to vector<1x128xf32>
      %18 = arith.addf %17, %16 : vector<1x128xf32>
      %19 = arith.divf %17, %18 : vector<1x128xf32>
      %c0_12 = arith.constant 0 : index
      %c0_13 = arith.constant 0 : index
      %20 = vector.load %arg3[%c0_12, %c0_13] : memref<1x128xf32, #tpu.memory_space<vmem>>, vector<1x128xf32>
      tpu.vector_store %arg3[%c0_12, %c0_13], %19 {strides = array<i32>} : memref<1x128xf32, #tpu.memory_space<vmem>>, vector<1x128xf32>,
    } else {
    }
    return
  }
  func.func @transform_0(%arg0: i32, %arg1: i32) -> (i32, i32) {
    %c0_i32 = arith.constant 0 : i32
    return %arg1, %arg0 : i32, i32
  }
  func.func @transform_1(%arg0: i32, %arg1: i32) -> (i32, i32) {
    %c0_i32 = arith.constant 0 : i32
    %c0_i32_0 = arith.constant 0 : i32
    return %c0_i32, %arg0 : i32, i32
  }
}

</mosaic_0001>

<bundles_post_ra>
// kernel: tpu_custom_call.1
= control target key start
LH: loop header
LB: loop body
LE: loop exit
PB: predicated region body
PF: predicated region fallthrough
CT: control target
= control target key end

     0   :  { %6 = vsyncpa [#allocation3], 0  ;;  %s634_s0 = inlined_call_operand.hbm [shape: f32[64,256], index: 0, kind: input, shape index: {}]   ;;  %s635_s1 = inlined_call_operand.hbm [shape: f32[1,256], index: 1, kind: output, shape index: {}]  }
   0x1   :  { %8 = vsyncpa [#allocation3 + $0x1], 0 }
   0x2   :  { %9 = vsyncpa [#allocation4], 0 }
   0x3   :  { %11 = vsyncpa [#allocation4 + $0x1], 0  ;;  %s489_s6 = smov 0   ;;  %s491_s7 = smov 0  }
   0x4   :  { %s493_s8 = smov 0   ;;  %s495_s9 = smov 0  }
   0x5   :  { %s497_s10 = smov 0   ;;  %s499_s11 = smov 0  }
   0x6 LB: > { %s281_s12 = sadd.s32 4294967295, %s471_s11   ;;  %s282_s13 = sadd.s32 4294967294, %s471_s11   ;;  %s471_s11 = sphi %s499_s11, %s17_s11   ;;  %s467_s10 = sphi %s497_s10, %s646_s10   ;;  %s463_s9 = sphi %s495_s9, %s645_s9   ;;  %s459_s8 = sphi %s493_s8, %s644_s8   ;;  %s455_s7 = sphi %s491_s7, %s643_s7   ;;  %s451_s6 = sphi %s489_s6, %s642_s6  }
   0x7   : > { %s29_s14 = sadd.s32 1, %s467_s10  ;;  %s38_s15 = sadd.s32 1, %s459_s8 }
   0x8   : > { %p31_p0 = scmp.ge.s32.totalorder %s29_s14, 2  ;;  %p45_p1 = scmp.ne.s32.totalorder %s459_s8, %s455_s7 }
   0x9   : > { %p46_p2 = scmp.eq.s32.totalorder %s471_s11, 0  ;;  %p51_p3 = scmp.ne.s32.totalorder %s455_s7, %s451_s6 }
   0xa   : > { %s648_s14 = smov (%p31_p0, %s29_s14), 0  ;;  %p52_p5 = scmp.eq.s32.totalorder %s281_s12, 0 }
   0xb   : > { %p530_p4 = por %p46_p2, %p45_p1  ;;  %s34_s17 = ssub.s32 %s467_s10, %s648_s14 }
   0xc   : > { %p75_p6 = scmp.eq.s32.totalorder %s281_s12, 1  ;;  %p36_p7 = scmp.eq.s32.totalorder %s34_s17, 0 }
   0xd   : > { %p536_p8 = por %p52_p5, %p51_p3  ;;  %p81_p10 = scmp.eq.s32.totalorder %s282_s13, 1 }
   0xe   : > { %p540_p9 = por %p75_p6, %p45_p1  ;;  %p305_p13 = scmp.lt.s32.totalorder %s471_s11, 2 }
   0xf   : > { %s545_s20 = scalar_select %p36_p7, %s459_s8, %s38_s15  }
  0x10   : > { %p547_p11 = por %p81_p10, %p51_p3  ;;  %s101_s22 = sand.u32 1, %s459_s8  }
  0x11   : > { %s285_s23 = sshll.u32 %s101_s22, 6  ;;  %s286_s24 = sshll.u32 %s467_s10, 7 }
  0x12   : > { %s113_s27 = scalar_lea.hbm %s634_s0, %s286_s24  ;;  %s105_s28 = scalar_lea.vmem [#allocation2], %s285_s23 }
  0x13   : > { %s114_s29 = sshll.u32 %s105_s28, 4  ;;  %p560_p0 = pnand %p305_p13, %p530_p4  ;;  %s115_s29 = int_to_ptr.vmem [resolvable:$true] %s114_s29 }
  0x14   : > { %s102_s2 = scalar_lea.sflag [#allocation3], %s101_s22  ;;  %s376_s3 = scalar_lea.vmem %s115_s29, 1024 }
  0x15   : > { %p365_p1 = pneg %p560_p0  ;;  %p377_p2 = scmp.ne.s32.totalorder %s115_s29, %s376_s3 }
  0x16   : > { %s473_s4 = smov [#allocation2]  }
  0x17   : > { %p379_p3 = pnand %p377_p2, %p365_p1  ;;  %s381_s5 = sshll.u32 %s473_s4, 4  ;;  %s382_s5 = int_to_ptr.vmem [resolvable:$false] %s381_s5 }
  0x18   : > { %s383_s12 = scalar_lea.vmem %s382_s5, 2048  ;;  %p384_p6 = scmp.lt.s32.totalorder %s115_s29, %s382_s5 }
  0x19   : > { %p380_p5 = pneg %p379_p3  ;;  %p385_p7 = scmp.lt.s32.totalorder %s383_s12, %s376_s3 }
  0x1b   : > { %p386_p10 = por %p385_p7, %p384_p6 }
  0x1d   : > { %p387_p12 = pnand %p386_p10, %p380_p5 }
  0x1f   : > { %390 = shalt.err (!%p387_p12)
}
  0x20   : > { %s474_s13 = smov 256   ;;  %s475_s15 = smov 128  }
  0x21   : > { %s476_s16 = smov 8   ;;  %p287_p4 = scmp.ge.s32.totalorder %s471_s11, 1 }
  0x22   : > { %300 = dma.hbm_to_vmem [thread:$0]  (!%p560_p0), %s113_s27, 1024, %s115_s29, %s102_s2, %s474_s13, %s475_s15, %s476_s16  }
  0x23   : > { %p122_p13 = scmp.lt.s32.totalorder %s471_s11, 3 }
  0x25   : > { %p123_p1 = pnand %p287_p4, %p122_p13 }
  0x26   : > { %s571_s17 = sand.u32 (!%p123_p1), 1, %s455_s7  }
  0x27   : > { %126 = sbr.rel (%p123_p1) target bundleno = 129 (0x81), region = 24  ;;  %s288_s22 = sshll.u32 (!%p123_p1), %s571_s17, 6 }
  0x28   : > { %s129_s23 = scalar_lea.sflag (!%p123_p1), [#allocation3], %s571_s17  ;;  %s132_s24 = scalar_lea.vmem (!%p123_p1), [#allocation2], %s288_s22 }
  0x2c   : > { %442 = dma.done.wait (%p536_p8), %s129_s23, 1024  }
  0x2d   : > { %444 = vsyncadd (%p536_p8), %s129_s23, 4294966272  ;;  %s580_s25 = scalar_lea.vmem [#allocation5], %s571_s17  ;;  %v477_v0 = vmov 0.0   ;;  %v156_v1 = vld [vmem:[%s132_s24] sm:$0xff]  ;;  %v157_v2 = vld [vmem:[%s132_s24 + $0x8] sm:$0xff]  ;;  %s290_s18 = sshll.u32 %s463_s9, 4 }
  0x2e   : > { %155 = vst [vmem:[%s580_s25] sm:$0x1] %v477_v0  ;;  %v158_v3 = vld [vmem:[%s132_s24 + $0x10] sm:$0xff]  ;;  %v165_v4 = vadd.f32 %v157_v2, %v156_v1  ;;  %v159_v5 = vld [vmem:[%s132_s24 + $0x18] sm:$0xff]  ;;  %v160_v7 = vld [vmem:[%s132_s24 + $0x20] sm:$0xff]  ;;  %s205_s26 = sshll.u32 %s580_s25, 4  ;;  %s591_s29 = scalar_lea.hbm %s635_s1, %s290_s18  ;;  %s206_s26 = int_to_ptr.vmem [resolvable:$true] %s205_s26 }
  0x2f   : > { %v161_v9 = vld [vmem:[%s132_s24 + $0x28] sm:$0xff]  ;;  %v162_v11 = vld [vmem:[%s132_s24 + $0x30] sm:$0xff]  ;;  %v163_v13 = vld [vmem:[%s132_s24 + $0x38] sm:$0xff]  ;;  %s193_s30 = scalar_lea.sflag [#allocation4], %s571_s17  ;;  %s391_s2 = scalar_lea.vmem %s206_s26, 16 }
  0x30   : > { %v166_v6 = vadd.f32 %v165_v4, %v158_v3  ;;  %p392_p8 = scmp.ne.s32.totalorder %s206_s26, %s391_s2  ;;  %s478_s3 = smov [#allocation5]  }
  0x31   : > { %s395_s4 = sshll.u32 %s478_s3, 4  ;;  %s396_s4 = int_to_ptr.vmem [resolvable:$false] %s395_s4 }
  0x32   : > { %v167_v8 = vadd.f32 %v166_v6, %v159_v5  ;;  %p393_p12 = pnand %p392_p8, %p540_p9  ;;  %s397_s5 = scalar_lea.vmem %s396_s4, 32 }
  0x33   : > { %p398_p2 = scmp.lt.s32.totalorder %s206_s26, %s396_s4  ;;  %p399_p3 = scmp.lt.s32.totalorder %s397_s5, %s391_s2 }
  0x34   : > { %v168_v10 = vadd.f32 %v167_v8, %v160_v7  ;;  %p394_p0 = pneg %p393_p12 }
  0x35   : > { %v164_v21 = vld [vmem:[%s580_s25] sm:$0x1]  ;;  %p400_p5 = por %p399_p3, %p398_p2 }
  0x36   : > { %v169_v12 = vadd.f32 %v168_v10, %v161_v9 }
  0x37   : > { %p401_p6 = pnand %p400_p5, %p394_p0 }
  0x38   : > { %v170_v14 = vadd.f32 %v169_v12, %v162_v11 }
  0x3a   : > { %v171_v15 = vadd.f32 %v170_v14, %v163_v13 }
  0x3c   : > { %v172_v16 = vrot.slane %v171_v15, 4 }
  0x3e   : > { %v173_v17 = vadd.f32 %v172_v16, %v171_v15 }
  0x40   : > { %v174_v18 = vrot.slane %v173_v17, 2 }
  0x42   : > { %v175_v19 = vadd.f32 %v174_v18, %v173_v17 }
  0x44   : > { %v176_v20 = vrot.slane %v175_v19, 1 }
  0x46   : > { %v177_v22 = vadd.f32 %v176_v20, %v175_v19 }
  0x48   : > { %v178_v23 = vadd.f32 %v177_v22, %v164_v21 }
  0x4a   : > { %179 = vst [vmem:[%s580_s25] sm:$0x1] %v178_v23 }
  0x51   : > { %v183_v24 = vld [vmem:[%s580_s25] sm:$0x1] }
  0x52   : > { %v289_v25 = vmul.f32 -0.015625, %v183_v24 }
  0x54   : > { %v186_v26 = vmul.f32 1.442695, %v289_v25 }
  0x56   : > { %359 = vpow2.f32 %v186_v26 }
  0x63   : > { %v360_v27 = vpop.eup %359 }
  0x64   : > { %v188_v28 = vadd.f32 1.0, %v360_v27 }
  0x66   : > { %361 = vrcp.f32 %v188_v28 }
  0x73   : > { %v362_v29 = vpop.eup %361 }
  0x74   : > { %191 = vst [vmem:[%s580_s25] sm:$0x1] %v362_v29 }
  0x75   : > { %404 = shalt.err (!%p401_p6)
}
  0x76   : > { %s405_s9 = scalar_lea.hbm %s591_s29, 16  ;;  %s409_s15 = scalar_lea.hbm %s635_s1, 32 }
  0x77   : > { %p406_p7 = scmp.ne.s32.totalorder %s591_s29, %s405_s9  ;;  %p410_p13 = scmp.lt.s32.totalorder %s591_s29, %s635_s1 }
  0x78   : > { %p411_p1 = scmp.lt.s32.totalorder %s409_s15, %s405_s9 }
  0x79   : > { %p407_p10 = pnand %p406_p7, %p540_p9 }
  0x7a   : > { %p412_p8 = por %p411_p1, %p410_p13 }
  0x7b   : > { %p408_p4 = pneg %p407_p10 }
  0x7d   : > { %p413_p12 = pnand %p412_p8, %p408_p4 }
  0x7f   : > { %416 = shalt.err (!%p413_p12)
}
  0x80   : > { %295 = dma.vmem_to_hbm [thread:$0]  (%p540_p9), %s206_s26, 16, %s591_s29, %s193_s30  }
  0x81 PF: > { %s217_s22 = sand.u32 1, %s451_s6   ;;  %p641_p0 = scmp.ge.s32.totalorder %s471_s11, 2 }
  0x82   : > { %s218_s23 = scalar_lea.sflag [#allocation4], %s217_s22 }
  0x83   : > { %p302_p2 = pnand %p641_p0, %p547_p11 }
  0x85   : > { %p303_p3 = pneg %p302_p2 }
  0x87   : > { %446 = dma.done.wait (%p303_p3), %s218_s23, 16  }
  0x88   : > { %448 = vsyncadd (%p303_p3), %s218_s23, 4294967280  ;;  %s17_s11 = sadd.s32 1, %s471_s11   ;;  %s642_s6 = smov %s455_s7 }
  0x89   : > { %p14_p5 = scmp.ge.s32.totalorder %s17_s11, 4   ;;  %s643_s7 = smov %s459_s8 }
  0x8a   : > { %s644_s8 = smov %s545_s20  ;;  %s645_s9 = smov %s467_s10 }
  0x8b   : > { %s646_s10 = smov %s648_s14  ;;  %16 = sbr.rel (!%p14_p5) target bundleno = 6 (0x6), region = 77 }
  0x90   :  { %222 = vsyncpa [#allocation3], 1 }
  0x91   :  { %224 = vsyncpa [#allocation3 + $0x1], 1 }
  0x92   :  { %225 = vsyncpa [#allocation4], 1 }
  0x93   :  { %227 = vsyncpa [#allocation4 + $0x1], 1 }

</bundles_post_ra>
